<compile_context>
chip_gen: v6e
topology: v6e:2x2x1
jax: 0.10.0
libtpu: 0.0.40
codegen_flags: <defaults>
</compile_context>

<pallas_src>
import functools
import math

import numpy as np
import jax
import jax.numpy as jnp
from jax import lax
from jax.experimental import pallas as pl
from jax.experimental.pallas import tpu as pltpu


def make_rope_tables(max_len: int, head_size: int):
    """sin/cos tables matching GlobalPointer.sinusoidal_position_embedding +
    the repeat_interleave(2) done in forward()."""
    pos = np.arange(max_len, dtype=np.float32)[:, None]
    idx = np.arange(head_size // 2, dtype=np.float32)
    theta = np.power(10000.0, -2.0 * idx / head_size)
    ang = pos * theta                                 # [L, D/2]
    cos_pos = np.repeat(np.cos(ang), 2, axis=-1)      # [cos0,cos0,cos1,cos1,...]
    sin_pos = np.repeat(np.sin(ang), 2, axis=-1)
    return jnp.asarray(sin_pos), jnp.asarray(cos_pos)


def _gp_logits_kernel(mrow_ref, q_ref, kt_ref, o_ref, bias_scr, *,
                      tq, tril_mask, scale, penalty):
    # mrow_ref : [1, L]   f32   padding mask (key axis, torch semantics)
    # q_ref    : [TQ, D]  bf16  one (batch, head, q-tile) query block (RoPE'd)
    # kt_ref   : [D, L]   bf16  one (batch, head) key block, transposed & pre-masked
    # o_ref    : [TQ, L]  f32   one output tile
    # bias_scr : [TQ, L]  f32   additive mask bias, built once per (batch, q-tile)
    qi = pl.program_id(1)
    h = pl.program_id(2)
    L = kt_ref.shape[1]

    # --- once per (batch, q-tile): combined key-padding + lower-triangle bias.
    #     heads is the innermost "arbitrary" grid axis, so the scratch is always
    #     freshly written before the h > 0 steps read it (also under megacore).
    @pl.when(h == 0)
    def _build_bias():
        pad_bias = (1.0 - mrow_ref[...]) * penalty                    # [1, L]
        if tril_mask:
            row = qi * tq + lax.broadcasted_iota(jnp.int32, (tq, L), 0)
            col = lax.broadcasted_iota(jnp.int32, (tq, L), 1)
            tril = jnp.where(row > col, jnp.float32(penalty), jnp.float32(0.0))
            bias_scr[...] = -(pad_bias + tril)
        else:
            bias_scr[...] = jnp.broadcast_to(-pad_bias, (tq, L))

    # --- per (batch, q-tile, head): one bf16 MXU matmul, f32 scale + bias epilogue.
    logits = jnp.dot(q_ref[...], kt_ref[...],
                     preferred_element_type=jnp.float32)              # [TQ, L]
    o_ref[...] = (logits * scale + bias_scr[...]).astype(o_ref.dtype)


def _pick_query_tile(L: int) -> int:
    # Prefer large lane-dense tiles, but keep >=2 q-tiles when possible so the
    # q-tile axis contributes megacore parallelism even at batch == 1.
    for cand in (512, 256, 128):
        if L % cand == 0 and cand < L:
            return cand
    return L


def global_pointer_forward(x, mask, W, bias, *, heads, head_size,
                           rope=True, tril_mask=True, out_dtype=jnp.float32):
    B, L, hidden = x.shape
    D = head_size
    assert W.shape == (hidden, heads * 2 * D)
    scale = 1.0 / math.sqrt(D)
    penalty = 1e12 * scale           # mask penalty, already divided by sqrt(D)

    if bias is None:
        bias = jnp.zeros((heads * 2 * D,), jnp.float32)
    if mask is None:
        mask = jnp.ones((B, L), jnp.float32)
    maskf = mask.astype(jnp.float32)

    # ---- projection + RoPE hoisted to plain JAX (per perf review) ----------------
    proj = (x @ W + bias).reshape(B, L, heads, 2, D)     # [B, L, H, 2, D]
    qw = proj[..., 0, :]                                 # [B, L, H, D]
    kw = proj[..., 1, :]
    if rope:
        sin_pos, cos_pos = make_rope_tables(L, D)        # [L, D] each
        cos = cos_pos[None, :, None, :]
        sin = sin_pos[None, :, None, :]

        def rotate_half(v):
            vp = v.reshape(B, L, heads, D // 2, 2)
            return jnp.stack([-vp[..., 1], vp[..., 0]], axis=-1).reshape(v.shape)

        qw = qw * cos + rotate_half(qw) * sin
        kw = kw * cos + rotate_half(kw) * sin

    # Fold the key-padding mask into k (0/1 factors -> exact in bf16), lay q out as
    # [B, H, L, D] and k TRANSPOSED as [B, H, D, L] so per-head kernel blocks start at
    # offset 0 (no 64-lane relayouts) and the inner dot needs no per-step transpose.
    q_bhld = jnp.transpose(qw, (0, 2, 1, 3)).astype(jnp.bfloat16)          # [B,H,L,D]
    kT_bhdl = jnp.transpose(kw * maskf[:, :, None, None],
                            (0, 2, 3, 1)).astype(jnp.bfloat16)             # [B,H,D,L]
    mrow = maskf.reshape(B, 1, L)

    TQ = _pick_query_tile(L)
    n_qt = L // TQ

    kernel = functools.partial(_gp_logits_kernel, tq=TQ, tril_mask=tril_mask,
                               scale=scale, penalty=penalty)

    # ---- small, explicit VMEM budget (double-buffered blocks + bias scratch) ------
    est = (2 * TQ * D * 2        # q block (bf16)
           + 2 * D * L * 2       # kT block (bf16)
           + 2 * L * 4           # mask row
           + 2 * TQ * L * 4      # output tile (f32)
           + TQ * L * 4)         # bias scratch
    vmem_limit = int(min(max(4 * est, 8 * 1024 * 1024), 40 * 1024 * 1024))

    flops = int(2 * B * heads * L * L * D)
    bytes_accessed = int(B * heads * L * D * 2          # q (read once)
                         + B * heads * n_qt * D * L * 2  # kT (re-read per q tile)
                         + B * L * 4                     # mask
                         + B * heads * L * L * jnp.dtype(out_dtype).itemsize)

    return pl.pallas_call(
        kernel,
        out_shape=jax.ShapeDtypeStruct((B, heads, L, L), out_dtype),
        grid_spec=pltpu.PrefetchScalarGridSpec(
            num_scalar_prefetch=0,
            grid=(B, n_qt, heads),
            in_specs=[
                pl.BlockSpec((None, 1, L), lambda b, q, h: (b, 0, 0)),           # mask row
                pl.BlockSpec((None, None, TQ, D), lambda b, q, h: (b, h, q, 0)),  # q
                pl.BlockSpec((None, None, D, L), lambda b, q, h: (b, h, 0, 0)),   # kT
            ],
            out_specs=pl.BlockSpec((None, None, TQ, L),
                                   lambda b, q, h: (b, h, q, 0)),
            scratch_shapes=[pltpu.VMEM((TQ, L), jnp.float32)]),
        compiler_params=pltpu.CompilerParams(
            dimension_semantics=("parallel", "parallel", "arbitrary"),
            vmem_limit_bytes=vmem_limit),
        cost_estimate=pl.CostEstimate(flops=flops, transcendentals=0,
                                      bytes_accessed=bytes_accessed),
    )(mrow, q_bhld, kT_bhdl)


def reference_forward(x, mask, W, bias, heads, head_size, rope=True,
                      tril_mask=True):
    """Pure-JAX f32 reference mirroring the PyTorch forward."""
    B, L, _ = x.shape
    D = head_size
    proj = x @ W + bias
    proj = proj.reshape(B, L, heads, 2 * D)
    qw, kw = proj[..., :D], proj[..., D:]
    if rope:
        sin_pos, cos_pos = make_rope_tables(L, D)
        cos = cos_pos[None, :, None, :]
        sin = sin_pos[None, :, None, :]

        def rot(v):
            vp = v.reshape(B, L, heads, D // 2, 2)
            v2 = jnp.stack([-vp[..., 1], vp[..., 0]], axis=-1).reshape(v.shape)
            return v * cos + v2 * sin

        qw, kw = rot(qw), rot(kw)
    logits = jnp.einsum('bmhd,bnhd->bhmn', qw, kw)
    if mask is not None:
        pm = mask.astype(jnp.float32)[:, None, None, :]
        logits = logits * pm - (1.0 - pm) * 1e12
    if tril_mask:
        tril = jnp.tril(jnp.ones((L, L), jnp.float32), -1)
        logits = logits - tril * 1e12
    return logits / math.sqrt(D)


if __name__ == "__main__":
    # Small shapes consistent with the module: seq_len == max_len == 8
    B, L, hidden = 2, 8, 32
    heads, head_size = 2, 16

    key = jax.random.PRNGKey(0)
    kx, kw, kb = jax.random.split(key, 3)

    x = jax.random.normal(kx, (B, L, hidden), jnp.float32)
    W = jax.random.normal(kw, (hidden, heads * 2 * head_size), jnp.float32) * 0.05
    bias = jax.random.normal(kb, (heads * 2 * head_size,), jnp.float32) * 0.05

    # padding mask: batch 0 full, batch 1 has 2 padded positions at the end
    mask = jnp.array([[1.0] * L,
                      [1.0] * (L - 2) + [0.0] * 2], jnp.float32)

    out = global_pointer_forward(x, mask, W, bias, heads=heads,
                                 head_size=head_size, tril_mask=True)
    out = jax.block_until_ready(out)

    ref = reference_forward(x, mask, W, bias, heads, head_size, tril_mask=True)
    assert out.shape == (B, heads, L, L)
    # bf16 MXU operands -> slightly looser tolerance vs the f32 reference.
    assert jnp.allclose(out, ref, rtol=2e-2, atol=2e-2), "mismatch vs reference"

    print("KERNEL_OK")
</pallas_src>

<mosaic_0001>
module attributes {stable_mosaic.version = 11 : i64} {
  func.func @_gp_logits_kernel(%arg0: i32, %arg1: i32, %arg2: i32, %arg3: memref<1x1x8xf32, #tpu.memory_space<vmem>>, %arg4: memref<1x1x8x16xbf16, #tpu.memory_space<vmem>>, %arg5: memref<1x1x16x8xbf16, #tpu.memory_space<vmem>>, %arg6: memref<1x1x8x8xf32, #tpu.memory_space<vmem>>, %arg7: memref<8x8xf32, #tpu.memory_space<vmem>>) attributes {dimension_semantics = [#tpu.dimension_semantics<parallel>, #tpu.dimension_semantics<parallel>, #tpu.dimension_semantics<arbitrary>], iteration_bounds = array<i64: 2, 1, 2>, scalar_prefetch = 0 : i64, scratch_operands = 1 : i64, tpu.core_type = #tpu.core_type<tc>, window_params = [{transform_indices = @transform_0, window_bounds = array<i64: 1, 1, 8>}, {transform_indices = @transform_1, window_bounds = array<i64: 1, 1, 8, 16>}, {transform_indices = @transform_2, window_bounds = array<i64: 1, 1, 16, 8>}, {transform_indices = @transform_3, window_bounds = array<i64: 1, 1, 8, 8>}]} {
    %c0_i32 = arith.constant 0 : i32
    %0 = arith.cmpi eq, %arg2, %c0_i32 : i32
    %1 = arith.extui %0 : i1 to i32
    %c0_i32_0 = arith.constant 0 : i32
    %2 = arith.cmpi ne, %1, %c0_i32_0 : i32
    scf.if %2 {
      %c0_15 = arith.constant 0 : index
      %c0_16 = arith.constant 0 : index
      %c0_17 = arith.constant 0 : index
      %15 = vector.load %arg3[%c0_15, %c0_16, %c0_17] : memref<1x1x8xf32, #tpu.memory_space<vmem>>, vector<1x1x8xf32>
      %16 = vector.shape_cast %15 : vector<1x1x8xf32> to vector<1x8xf32>
      %cst_18 = arith.constant 1.000000e+00 : f32
      %17 = vector.broadcast %cst_18 : f32 to vector<1x8xf32>
      %18 = arith.subf %17, %16 : vector<1x8xf32>
      %cst_19 = arith.constant 2.500000e+11 : f32
      %19 = vector.broadcast %cst_19 : f32 to vector<1x8xf32>
      %20 = arith.mulf %18, %19 : vector<1x8xf32>
      %c8_i32 = arith.constant 8 : i32
      %21 = arith.muli %arg1, %c8_i32 : i32
      %22 = tpu.iota {dimensions = array<i32: 0>} : vector<8x8xi32>
      %23 = vector.broadcast %21 : i32 to vector<8x8xi32>
      %24 = arith.addi %23, %22 : vector<8x8xi32>
      %25 = tpu.iota {dimensions = array<i32: 1>} : vector<8x8xi32>
      %26 = arith.cmpi sgt, %24, %25 : vector<8x8xi32>
      %cst_20 = arith.constant 2.500000e+11 : f32
      %cst_21 = arith.constant 0.000000e+00 : f32
      %27 = vector.broadcast %cst_20 : f32 to vector<8x8xf32>
      %28 = vector.broadcast %cst_21 : f32 to vector<8x8xf32>
      %29 = arith.select %26, %27, %28 : vector<8x8xi1>, vector<8x8xf32>
      %30 = vector.broadcast %20 : vector<1x8xf32> to vector<8x8xf32>
      %31 = arith.addf %30, %29 : vector<8x8xf32>
      %cst_22 = arith.constant 0.000000e+00 : f32
      %32 = vector.broadcast %cst_22 : f32 to vector<8x8xf32>
      %33 = arith.subf %32, %31 : vector<8x8xf32>
      %c0_23 = arith.constant 0 : index
      %c0_24 = arith.constant 0 : index
      %34 = vector.load %arg7[%c0_23, %c0_24] : memref<8x8xf32, #tpu.memory_space<vmem>>, vector<8x8xf32>
      tpu.vector_store %arg7[%c0_23, %c0_24], %33 {strides = array<i32>} : memref<8x8xf32, #tpu.memory_space<vmem>>, vector<8x8xf32>,
    } else {
    }
    %c0 = arith.constant 0 : index
    %c0_1 = arith.constant 0 : index
    %c0_2 = arith.constant 0 : index
    %c0_3 = arith.constant 0 : index
    %3 = vector.load %arg4[%c0, %c0_1, %c0_2, %c0_3] : memref<1x1x8x16xbf16, #tpu.memory_space<vmem>>, vector<1x1x8x16xbf16>
    %4 = vector.shape_cast %3 : vector<1x1x8x16xbf16> to vector<8x16xbf16>
    %c0_4 = arith.constant 0 : index
    %c0_5 = arith.constant 0 : index
    %c0_6 = arith.constant 0 : index
    %c0_7 = arith.constant 0 : index
    %5 = vector.load %arg5[%c0_4, %c0_5, %c0_6, %c0_7] : memref<1x1x16x8xbf16, #tpu.memory_space<vmem>>, vector<1x1x16x8xbf16>
    %6 = vector.shape_cast %5 : vector<1x1x16x8xbf16> to vector<16x8xbf16>
    %cst = arith.constant dense<0.000000e+00> : vector<8x8xf32>
    %7 = tpu.matmul %4, %6, %cst {dimension_numbers = #tpu.dot_dimension_numbers<[1], [0], [0], [1], [0, 0, 1, 1], [], []>} : vector<8x16xbf16>, vector<16x8xbf16>, vector<8x8xf32> -> vector<8x8xf32>
    %cst_8 = arith.constant 2.500000e-01 : f32
    %8 = vector.broadcast %cst_8 : f32 to vector<8x8xf32>
    %9 = arith.mulf %7, %8 : vector<8x8xf32>
    %c0_9 = arith.constant 0 : index
    %c0_10 = arith.constant 0 : index
    %10 = vector.load %arg7[%c0_9, %c0_10] : memref<8x8xf32, #tpu.memory_space<vmem>>, vector<8x8xf32>
    %11 = arith.addf %9, %10 : vector<8x8xf32>
    %c0_11 = arith.constant 0 : index
    %c0_12 = arith.constant 0 : index
    %c0_13 = arith.constant 0 : index
    %c0_14 = arith.constant 0 : index
    %12 = vector.load %arg6[%c0_11, %c0_12, %c0_13, %c0_14] : memref<1x1x8x8xf32, #tpu.memory_space<vmem>>, vector<1x1x8x8xf32>
    %13 = vector.shape_cast %12 : vector<1x1x8x8xf32> to vector<8x8xf32>
    %14 = vector.shape_cast %11 : vector<8x8xf32> to vector<1x1x8x8xf32>
    tpu.vector_store %arg6[%c0_11, %c0_12, %c0_13, %c0_14], %14 {strides = array<i32>} : memref<1x1x8x8xf32, #tpu.memory_space<vmem>>, vector<1x1x8x8xf32>,
    return
  }
  func.func @transform_0(%arg0: i32, %arg1: i32, %arg2: i32) -> (i32, i32, i32) {
    %c0_i32 = arith.constant 0 : i32
    %c0_i32_0 = arith.constant 0 : i32
    %c0_i32_1 = arith.constant 0 : i32
    return %arg0, %c0_i32, %c0_i32_0 : i32, i32, i32
  }
  func.func @transform_1(%arg0: i32, %arg1: i32, %arg2: i32) -> (i32, i32, i32, i32) {
    %c0_i32 = arith.constant 0 : i32
    %c0_i32_0 = arith.constant 0 : i32
    return %arg0, %arg2, %arg1, %c0_i32 : i32, i32, i32, i32
  }
  func.func @transform_2(%arg0: i32, %arg1: i32, %arg2: i32) -> (i32, i32, i32, i32) {
    %c0_i32 = arith.constant 0 : i32
    %c0_i32_0 = arith.constant 0 : i32
    %c0_i32_1 = arith.constant 0 : i32
    return %arg0, %arg2, %c0_i32, %c0_i32_0 : i32, i32, i32, i32
  }
  func.func @transform_3(%arg0: i32, %arg1: i32, %arg2: i32) -> (i32, i32, i32, i32) {
    %c0_i32 = arith.constant 0 : i32
    %c0_i32_0 = arith.constant 0 : i32
    return %arg0, %arg2, %arg1, %c0_i32 : i32, i32, i32, i32
  }
}

</mosaic_0001>

<bundles_post_ra>
// kernel: tpu_custom_call.1
= control target key start
LH: loop header
LB: loop body
LE: loop exit
PB: predicated region body
PF: predicated region fallthrough
CT: control target
= control target key end

     0   :  { %8 = vsyncpa [#allocation4], 0  ;;  %s853_s0 = inlined_call_operand.vmem [shape: f32[2,1,8], index: 0, kind: input, shape index: {}]   ;;  %s854_s1 = inlined_call_operand.vmem [shape: bf16[2,2,8,16], index: 1, kind: input, shape index: {}]   ;;  %s855_s2 = inlined_call_operand.vmem [shape: bf16[2,2,16,8], index: 2, kind: input, shape index: {}]   ;;  %s856_s3 = inlined_call_operand.hbm [shape: f32[2,2,8,8], index: 3, kind: output, shape index: {}]  }
   0x1   :  { %10 = vsyncpa [#allocation4 + $0x1], 0  ;;  %s699_s12 = smov 0   ;;  %s701_s13 = smov 0  }
   0x2   :  { %s703_s14 = smov 0   ;;  %s705_s15 = smov 0  }
   0x3   :  { %s707_s16 = smov 0   ;;  %s709_s17 = smov 0  }
   0x4   :  { %s711_s18 = smov 0   ;;  %s713_s19 = smov 0  }
   0x5 LB: > { %863 = sst [smem:[#allocation6_spill]] %s653_s14  ;;  %s479_s20 = sadd.s32 4294967295, %s673_s19   ;;  %s673_s19 = sphi %s713_s19, %s16_s19   ;;  %s669_s18 = sphi %s711_s18, %s877_s18   ;;  %s665_s17 = sphi %s709_s17, %s876_s17   ;;  %s661_s16 = sphi %s707_s16, %s875_s16   ;;  %s657_s15 = sphi %s705_s15, %s874_s15   ;;  %s653_s14 = sphi %s703_s14, %s873_s14   ;;  %s649_s13 = sphi %s701_s13, %s879_s13   ;;  %s645_s12 = sphi %s699_s12, %s878_s12  }
   0x6   : > { %864 = sst [smem:[#allocation7_spill]] %s665_s17  ;;  %s480_s21 = sadd.s32 4294967294, %s673_s19  }
   0x7   : > { %865 = sst [smem:[#allocation8_spill]] %s669_s18  ;;  %s28_s22 = sadd.s32 1, %s665_s17 }
   0x8   : > { %p29_p0 = scmp.ge.s32.totalorder %s28_s22, 2  ;;  %s35_s23 = sadd.s32 1, %s669_s18 }
   0x9   : > { %p140_p1 = scmp.ne.s32.totalorder %s653_s14, %s649_s13  ;;  %p141_p2 = scmp.eq.s32.totalorder %s479_s20, 3 }
   0xa   : > { %s881_s22 = smov (%p29_p0, %s28_s22), 0  ;;  %s883_s23 = smov (!%p29_p0, %s35_s23), %s669_s18 }
   0xb   : > { %866 = sst [smem:[#allocation9_spill]] %s881_s22  ;;  %s124_s24 = ssub.s32 %s665_s17, %s881_s22 }
   0xc   : > { %p750_p3 = por %p141_p2, %p140_p1  ;;  %p37_p4 = scmp.ge.s32.totalorder %s883_s23, 2 }
   0xd   : > { %p146_p5 = scmp.ne.s32.totalorder %s649_s13, %s645_s12  ;;  %p147_p6 = scmp.eq.s32.totalorder %s480_s21, 3 }
   0xe   : > { %p483_p7 = scmp.ge.s32.totalorder %s673_s19, 1  ;;  %s885_s23 = smov (%p37_p4, %s883_s23), 0 }
   0xf   : > { %868 = sst [smem:[#allocation10_spill]] %s885_s23  ;;  %p759_p8 = por %p147_p6, %p146_p5 }
  0x10   : > { %p197_p9 = scmp.lt.s32.totalorder %s673_s19, 5  ;;  %s123_s27 = ssub.s32 %s669_s18, %s885_s23 }
  0x11   : > { %s130_s28 = sadd.s32 1, %s653_s14  ;;  %s125_s29 = sor.u32 %s124_s24, %s123_s27 }
  0x12   : > { %p198_p10 = pnand %p483_p7, %p197_p9  ;;  %p128_p11 = scmp.eq.s32.totalorder %s125_s29, 0 }
  0x13   : > { %s859_s4 = sand.u32 (!%p198_p10), 1, %s649_s13   ;;  %p239_p12 = scmp.lt.s32.totalorder (!%p198_p10), %s661_s16, 1 }
  0x14   : > { %s768_s30 = scalar_select %p128_p11, %s653_s14, %s130_s28  }
  0x15   : > { %201 = sbr.rel (%p198_p10) target bundleno = 266 (0x10a), region = 32  ;;  %s774_s5 = sshll.u32 (!%p198_p10), %s859_s4, 3 }
  0x16   : > { %870 = sst [smem:[#allocation11_spill]] %s768_s30  ;;  %p244_p13 = scmp.lt.s32.totalorder (!%p198_p10), %s657_s15, 1 }
  0x17   : > { %s238_s14 = scalar_lea.vmem (!%p198_p10), [#allocation3], %s774_s5  ;;  %p490_p0 = scmp.ne.s32.totalorder (!%p198_p10), %s657_s15, 0 }
  0x1a   : > { %s240_s6 = scalar_select %p239_p12, %s661_s16, 1 }
  0x1b   : > { %s245_s7 = scalar_select %p244_p13, %s657_s15, 1 }
  0x1c   : > { %s241_s10 = scalar_lea.vmem %s853_s0, %s240_s6  ;;  %s485_s11 = sshll.u32 %s240_s6, 1 }
  0x1d   : > { %s250_s20 = sadd.s32 %s485_s11, %s245_s7  ;;  %s487_s21 = sshll.u32 %s245_s7, 1 }
  0x1e   : > { %s486_s24 = sshll.u32 %s250_s20, 2  ;;  %s488_s27 = sshll.u32 %s240_s6, 2 }
  0x1f   : > { %s252_s23 = scalar_lea.vmem %s854_s1, %s486_s24  ;;  %s259_s22 = sadd.s32 %s488_s27, %s487_s21 }
  0x20   : > { %s489_s4 = sshll.u32 %s259_s22, 2  ;;  %266 = sbr.rel (%p490_p0) target bundleno = 50 (0x32), region = 36 }
  0x21   : > { %s261_s30 = scalar_lea.vmem %s855_s2, %s489_s4 }
  0x25   : > { %v267_v0 = vld [vmem:[%s241_s10] sm:$0x1]  ;;  %v271_v1 = vlaneseq  ;;  %v675_v7 = vmov 0.0   ;;  %vm287_vm1 = vcmask 64512  }
  0x26   : > { %v268_v2 = vsub.f32 1.0, %v267_v0 }
  0x27   : > { %v272_v3 = vshrl.u32 %v271_v1, 7  ;;  %v276_v4 = vand.u32 127, %v271_v1 }
  0x28   : > { %v269_v5 = vmul.f32 2.5e+11, %v268_v2 }
  0x29   : > { %vm277_vm0 = vcmp.gt.s32.totalorder %v272_v3, %v276_v4  ;;  %v282_v6 = vsub.s32 0, %v272_v3 }
  0x2a   : > { %v278_v8 = vsel %vm277_vm0, 2.5e+11, %v675_v7 }
  0x2b   : > { %v283_v9 = vrot.slane %v269_v5, %v282_v6 }
  0x2d   : > { %v285_v10 = vadd.f32 %v283_v9, %v278_v8 }
  0x2f   : > { %v286_v11 = vsub.f32 0.0, %v285_v10 }
  0x31   : > { %288 = vst.msk [vmem:[#allocation2] sm:$0xff] %vm287_vm1, %v286_v11 }
  0x32 PF: > { %v580_v12 = vld [vmem:[%s261_s30] sm:$0xff]   ;;  %v676_v13 = vmov 0.0   ;;  %vm677_vm2 = vmmov 0   ;;  %vm298_vm3 = vcmask 130048   ;;  %s494_s17 = sshll.u32 %s661_s16, 1  ;;  %s364_s30 = sshll.u32 %s238_s14, 4  ;;  %s799_s30 = int_to_ptr.vmem [resolvable:$true] %s364_s30 }
  0x33   : > { %500 = vmatprep.subr.bf16.mxu0 %v676_v13  ;;  %502 = vmatprep.mubr.msk.bf16.mxu0 %vm677_vm2, %v676_v13  ;;  %v289_v14 = vld [vmem:[%s252_s23] sm:$0xf]  ;;  %s360_s18 = sadd.s32 %s657_s15, %s494_s17  ;;  %vm345_vm4 = vcmask 64512   ;;  %s871_s15 = sand.u32 1, %s649_s13  }
  0x34   : > { %501 = vmatpush3.bf16.msra.mxu0 %v580_v12  ;;  %s495_s22 = sshll.u32 %s360_s18, 7  ;;  %s348_s16 = scalar_lea.sflag [#allocation4], %s871_s15 }
  0x35   : > { %s797_s23 = scalar_lea.hbm %s856_s3, %s495_s22  ;;  %s581_s7 = scalar_lea.vmem %s799_s30, 128 }
  0x36   : > { %p582_p1 = scmp.ne.s32.totalorder %s799_s30, %s581_s7  ;;  %s678_s8 = smov [#allocation3]  }
  0x37   : > { %503 = vmatmul.mubr.msk.bf16.vlgmr.msra.gmra.mxu0 %vm298_vm3, %v289_v14  ;;  %s585_s9 = sshll.u32 %s678_s8, 4  ;;  %s586_s9 = int_to_ptr.vmem [resolvable:$false] %s585_s9 }
  0x38   : > { %v343_v16 = vld [vmem:[#allocation2] sm:$0xff]  ;;  %p583_p2 = pnand %p582_p1, %p750_p3  ;;  %s587_s10 = scalar_lea.vmem %s586_s9, 256 }
  0x39   : > { %p588_p5 = scmp.lt.s32.totalorder %s799_s30, %s586_s9  ;;  %p589_p6 = scmp.lt.s32.totalorder %s587_s10, %s581_s7 }
  0x3a   : > { %p584_p4 = pneg %p583_p2 }
  0x3b   : > { %p590_p7 = por %p589_p6, %p588_p5 }
  0x3d   : > { %p591_p9 = pnand %p590_p7, %p584_p4 }
  0xf7   : > { %v336_v15 = vpop.f32.mrf.mxu0 }
  0xf8   : > { %v342_v17 = vmul.f32 0.25, %v336_v15 }
  0xf9   : > { %v504_v18 = vpop.f32.mrf.mxu0 }
  0xfa   : > { %v344_v19 = vadd.f32 %v343_v16, %v342_v17 }
  0xfb   : > { %v339_v20 = vpop.f32.mrf.mxu0 }
  0xfc   : > { %346 = vst.msk [vmem:[%s238_s14] sm:$0xff] %vm345_vm4, %v344_v19 }
  0xfd   : > { %v505_v21 = vpop.f32.mrf.mxu0 }
  0xfe   : > { %594 = shalt.err (!%p591_p9)
}
  0xff   : > { %s595_s14 = scalar_lea.hbm %s797_s23, 128  ;;  %s599_s20 = scalar_lea.hbm %s856_s3, 512 }
 0x100   : > { %p596_p10 = scmp.ne.s32.totalorder %s797_s23, %s595_s14  ;;  %p600_p13 = scmp.lt.s32.totalorder %s797_s23, %s856_s3 }
 0x101   : > { %p601_p0 = scmp.lt.s32.totalorder %s599_s20, %s595_s14 }
 0x102   : > { %p597_p11 = pnand %p596_p10, %p750_p3 }
 0x103   : > { %p602_p1 = por %p601_p0, %p600_p13 }
 0x104   : > { %p598_p12 = pneg %p597_p11 }
 0x106   : > { %p603_p2 = pnand %p602_p1, %p598_p12 }
 0x108   : > { %606 = shalt.err (!%p603_p2)
}
 0x109   : > { %506 = dma.vmem_to_hbm [thread:$0]  (%p750_p3), %s799_s30, 128, %s797_s23, %s348_s16  }
 0x10a PF: > { %p512_p4 = scmp.ge.s32.totalorder %s673_s19, 2  ;;  %s376_s27 = sand.u32 1, %s645_s12  }
 0x10b   : > { %s377_s28 = scalar_lea.sflag [#allocation4], %s376_s27 }
 0x10c   : > { %p509_p5 = pnand %p512_p4, %p759_p8 }
 0x10e   : > { %p510_p6 = pneg %p509_p5 }
 0x110   : > { %640 = dma.done.wait (%p510_p6), %s377_s28, 128  }
 0x111   : > { %642 = vsyncadd (%p510_p6), %s377_s28, 4294967168  ;;  %s16_s19 = sadd.s32 1, %s673_s19   ;;  %s872_s25 = sld [smem:[#allocation6_spill]] }
 0x112   : > { %p13_p7 = scmp.ge.s32.totalorder %s16_s19, 6   ;;  %s873_s14 = sld [smem:[#allocation11_spill]] }
 0x113   : > { %s874_s15 = sld [smem:[#allocation7_spill]]  ;;  %s878_s12 = smov %s649_s13 }
 0x114   : > { %s875_s16 = sld [smem:[#allocation8_spill]]  ;;  %15 = sbr.rel (!%p13_p7) target bundleno = 5 (0x5), region = 77 }
 0x115   : > { %s876_s17 = sld [smem:[#allocation9_spill]] }
 0x116   : > { %s877_s18 = sld [smem:[#allocation10_spill]] }
 0x117   : > { %s879_s13 = smov %s872_s25 }
 0x119   :  { %382 = vsyncpa [#allocation4], 1 }
 0x11a   :  { %384 = vsyncpa [#allocation4 + $0x1], 1 }

</bundles_post_ra>
